<compile_context>
chip_gen: v7x
topology: tpu7x:2x2x1
jax: 0.10.0
libtpu: 0.0.40
codegen_flags: <defaults>
</compile_context>

<pallas_src>
import functools

import jax
import jax.numpy as jnp
from jax.experimental import pallas as pl
from jax.experimental.pallas import tpu as pltpu


def _convblock_kernel(x_ref, w_ref, b_ref, gamma_ref, beta_ref, gm_ref, vm_ref,
                      o_ref, *, H, W, Wp, Cin, Cout, eps, use_gn, TB):
    """One grid step = TB images.

    x_ref : (TB, Cin, FLAT_IN)   flattened reflect-padded images (row width Wp)
    w_ref : (9, Cout, Cin)       per-tap conv weights, tap index = dy*3 + dx
    b_ref, gamma_ref, beta_ref : (Cout, 1)
    gm_ref: (Cout, Cout)         same-group averaging matrix (1/(gs*H*W) entries)
    vm_ref: (1, FLAT_OUT)        1.0 on valid columns, 0.0 on the 2 junk cols/row
    o_ref : (TB, Cout, FLAT_OUT) channel-major flattened output (junk cols incl.)
    """
    flat_out = H * Wp
    vmask = vm_ref[...]                              # (1, FLAT_OUT)
    bias = b_ref[...]                                # (Cout, 1)
    taps = [w_ref[t] for t in range(9)]              # 9 x (Cout, Cin), hoisted
    if use_gn:
        gmat = gm_ref[...]
        gam = gamma_ref[...]
        bet = beta_ref[...]

    for b in range(TB):                              # static unroll over batch tile
        # ---- conv: 9 accumulating taps, each a contiguous lane slice ----------
        acc = jnp.zeros((Cout, flat_out), jnp.float32)
        for dy in range(3):
            for dx in range(3):
                off = dy * Wp + dx
                slab = x_ref[b, :, off:off + flat_out]        # (Cin, FLAT_OUT)
                acc = acc + jnp.dot(taps[dy * 3 + dx], slab,
                                    preferred_element_type=jnp.float32)
        y = acc + bias                                        # (Cout, FLAT_OUT)

        # ---- GroupNorm over valid pixels only (junk columns masked out) -------
        if use_gn:
            s1 = jnp.sum(y * vmask, axis=1, keepdims=True)    # (Cout, 1)
            mean_c = jnp.dot(gmat, s1,
                             preferred_element_type=jnp.float32)   # per-channel group mean
            yc = y - mean_c
            d = yc * vmask
            s2 = jnp.sum(d * d, axis=1, keepdims=True)
            var_c = jnp.dot(gmat, s2,
                            preferred_element_type=jnp.float32)    # centered group variance
            inv_c = jax.lax.rsqrt(var_c + eps)
            y = yc * inv_c * gam + bet

        # ---- SiLU --------------------------------------------------------------
        y = y * jax.nn.sigmoid(y)

        o_ref[b] = y.astype(o_ref.dtype)


def _pick_batch_tile(n, bytes_per_image, cap=8, vmem_budget=4 << 20):
    """Largest divisor of n (<= cap) whose double-buffered working set fits the
    budget, while keeping >= 2 grid steps when n >= 2 so both TensorCores of a
    v7x megacore get work."""
    cap = min(cap, max(1, n // 2))
    tb = 1
    for d in range(1, cap + 1):
        if n % d == 0 and d * bytes_per_image <= vmem_budget:
            tb = d
    return tb


def conv_block_forward(x_nchw, w_oihw, bias, gamma, beta, *, groups=8, eps=1e-5):
    """ConvBlock forward. x_nchw: (N, Cin, H, W) float32 (PyTorch layout).

    Returns (N, Cout, H, W) float32. GroupNorm is skipped when Cout == 3
    (matching the nn.Identity branch of the module)."""
    N, Cin, H, W = x_nchw.shape
    Cout = w_oihw.shape[0]
    use_gn = (Cout != 3)
    Wp = W + 2
    flat_in = (H + 3) * Wp          # 1 top pad row + 2 bottom rows (1 reflect + 1 spare)
    flat_out = H * Wp               # 2 junk columns per row, masked in GN & sliced after

    # Reflect pad, staying in NCHW (no layout transpose anywhere).  The single
    # spare bottom row only feeds the junk columns of the last output row so
    # every tap's lane slice of the flattened image stays in bounds.
    if H >= 3:
        xp = jnp.pad(x_nchw, ((0, 0), (0, 0), (1, 2), (1, 1)), mode="reflect")
    else:
        xp = jnp.pad(x_nchw, ((0, 0), (0, 0), (1, 1), (1, 1)), mode="reflect")
        xp = jnp.pad(xp, ((0, 0), (0, 0), (0, 1), (0, 0)))
    x_flat = xp.reshape(N, Cin, flat_in).astype(jnp.float32)

    # Per-tap weights: w_taps[dy*3+dx] = w[:, :, dy, dx] -> (9, Cout, Cin)
    w_taps = jnp.transpose(w_oihw, (2, 3, 0, 1)).reshape(9, Cout, Cin).astype(jnp.float32)
    b2 = bias.reshape(Cout, 1).astype(jnp.float32)
    g2 = gamma.reshape(Cout, 1).astype(jnp.float32)
    be2 = beta.reshape(Cout, 1).astype(jnp.float32)

    # Group-averaging matrix, built ONCE outside the kernel:
    # gm[c, c'] = 1/(gs*H*W) if channels c, c' belong to the same GroupNorm group.
    if use_gn:
        assert Cout % groups == 0, "GroupNorm requires Cout % groups == 0"
        gs = Cout // groups
        cid = jnp.arange(Cout)
        gm = (cid[:, None] // gs == cid[None, :] // gs).astype(jnp.float32)
        gm = gm / float(gs * H * W)
    else:
        gm = jnp.zeros((Cout, Cout), jnp.float32)   # dead input (Identity branch)

    # Validity mask over the flattened (H, Wp) output grid.
    vmask = (jnp.arange(flat_out) % Wp < W).astype(jnp.float32).reshape(1, flat_out)

    bytes_per_image = 4 * 2 * (Cin * flat_in + Cout * flat_out)   # dbl-buffered in+out
    TB = _pick_batch_tile(N, bytes_per_image)

    kernel = functools.partial(
        _convblock_kernel, H=H, W=W, Wp=Wp, Cin=Cin, Cout=Cout,
        eps=eps, use_gn=use_gn, TB=TB)

    out_flat = pl.pallas_call(
        kernel,
        out_shape=jax.ShapeDtypeStruct((N, Cout, flat_out), jnp.float32),
        grid=(N // TB,),
        in_specs=[
            pl.BlockSpec((TB, Cin, flat_in), lambda n: (n, 0, 0)),
            pl.BlockSpec((9, Cout, Cin), lambda n: (0, 0, 0)),
            pl.BlockSpec((Cout, 1), lambda n: (0, 0)),
            pl.BlockSpec((Cout, 1), lambda n: (0, 0)),
            pl.BlockSpec((Cout, 1), lambda n: (0, 0)),
            pl.BlockSpec((Cout, Cout), lambda n: (0, 0)),
            pl.BlockSpec((1, flat_out), lambda n: (0, 0)),
        ],
        out_specs=pl.BlockSpec((TB, Cout, flat_out), lambda n: (n, 0, 0)),
        compiler_params=pltpu.CompilerParams(
            dimension_semantics=("parallel",),
            vmem_limit_bytes=48 * 1024 * 1024),
    )(x_flat, w_taps, b2, g2, be2, gm, vmask)

    # (N, Cout, H*Wp) -> (N, Cout, H, W): drop the 2 junk columns of each row.
    # (pure NCHW output; no transpose pass needed.)
    return out_flat.reshape(N, Cout, H, Wp)[:, :, :, :W]


def _ref_forward(x_nchw, w_oihw, bias, gamma, beta, *, groups=8, eps=1e-5):
    """Pure-JAX reference (mirrors the PyTorch module)."""
    Cout = w_oihw.shape[0]
    xp = jnp.pad(x_nchw, ((0, 0), (0, 0), (1, 1), (1, 1)), mode="reflect")
    y = jax.lax.conv_general_dilated(
        xp, w_oihw, window_strides=(1, 1), padding="VALID",
        dimension_numbers=("NCHW", "OIHW", "NCHW"))
    y = y + bias[None, :, None, None]
    if Cout != 3:
        N, C, H, W = y.shape
        yg = y.reshape(N, groups, C // groups, H, W)
        mean = yg.mean(axis=(2, 3, 4), keepdims=True)
        var = ((yg - mean) ** 2).mean(axis=(2, 3, 4), keepdims=True)
        yg = (yg - mean) * jax.lax.rsqrt(var + eps)
        y = yg.reshape(N, C, H, W) * gamma[None, :, None, None] + beta[None, :, None, None]
    return y * jax.nn.sigmoid(y)


if __name__ == "__main__":
    # small shapes: batch=2, in_channels=4, out_channels=16, spatial=16
    N, Cin, Cout, H, W = 2, 4, 16, 16, 16

    key = jax.random.PRNGKey(0)
    kx, kw, kb = jax.random.split(key, 3)
    x = jax.random.normal(kx, (N, Cin, H, W), dtype=jnp.float32)
    # deterministic synthetic parameters (Conv2d weight/bias; GroupNorm affine defaults)
    w = jax.random.normal(kw, (Cout, Cin, 3, 3), dtype=jnp.float32) * 0.1
    b = jax.random.normal(kb, (Cout,), dtype=jnp.float32) * 0.05
    gamma = jnp.ones((Cout,), dtype=jnp.float32)   # nn.GroupNorm default weight
    beta = jnp.zeros((Cout,), dtype=jnp.float32)   # nn.GroupNorm default bias

    fwd = jax.jit(conv_block_forward)
    out = jax.block_until_ready(fwd(x, w, b, gamma, beta))

    ref = jax.block_until_ready(_ref_forward(x, w, b, gamma, beta))
    assert out.shape == (N, Cout, H, W)
    assert jnp.allclose(out, ref, atol=1e-4, rtol=1e-4), "mismatch vs reference"

    print("KERNEL_OK")
</pallas_src>

<mosaic_0001>
module attributes {stable_mosaic.version = 11 : i64} {
  func.func @_convblock_kernel(%arg0: i32, %arg1: memref<1x4x342xf32, #tpu.memory_space<vmem>>, %arg2: memref<9x16x4xf32, #tpu.memory_space<vmem>>, %arg3: memref<16x1xf32, #tpu.memory_space<vmem>>, %arg4: memref<16x1xf32, #tpu.memory_space<vmem>>, %arg5: memref<16x1xf32, #tpu.memory_space<vmem>>, %arg6: memref<16x16xf32, #tpu.memory_space<vmem>>, %arg7: memref<1x288xf32, #tpu.memory_space<vmem>>, %arg8: memref<1x16x288xf32, #tpu.memory_space<vmem>>) attributes {dimension_semantics = [#tpu.dimension_semantics<parallel>], iteration_bounds = array<i64: 2>, scalar_prefetch = 0 : i64, scratch_operands = 0 : i64, tpu.core_type = #tpu.core_type<tc>, window_params = [{transform_indices = @transform_0, window_bounds = array<i64: 1, 4, 342>}, {pipeline_mode = #tpu.pipeline_mode<synchronous>, transform_indices = @transform_1, window_bounds = array<i64: 9, 16, 4>}, {pipeline_mode = #tpu.pipeline_mode<synchronous>, transform_indices = @transform_2, window_bounds = array<i64: 16, 1>}, {pipeline_mode = #tpu.pipeline_mode<synchronous>, transform_indices = @transform_3, window_bounds = array<i64: 16, 1>}, {pipeline_mode = #tpu.pipeline_mode<synchronous>, transform_indices = @transform_4, window_bounds = array<i64: 16, 1>}, {pipeline_mode = #tpu.pipeline_mode<synchronous>, transform_indices = @transform_5, window_bounds = array<i64: 16, 16>}, {pipeline_mode = #tpu.pipeline_mode<synchronous>, transform_indices = @transform_6, window_bounds = array<i64: 1, 288>}, {transform_indices = @transform_7, window_bounds = array<i64: 1, 16, 288>}]} {
    %c0 = arith.constant 0 : index
    %c0_0 = arith.constant 0 : index
    %0 = vector.load %arg7[%c0, %c0_0] : memref<1x288xf32, #tpu.memory_space<vmem>>, vector<1x288xf32>
    %c0_1 = arith.constant 0 : index
    %c0_2 = arith.constant 0 : index
    %1 = vector.load %arg3[%c0_1, %c0_2] : memref<16x1xf32, #tpu.memory_space<vmem>>, vector<16x1xf32>
    %c0_3 = arith.constant 0 : index
    %c0_4 = arith.constant 0 : index
    %c0_5 = arith.constant 0 : index
    %2 = vector.load %arg2[%c0_3, %c0_4, %c0_5] : memref<9x16x4xf32, #tpu.memory_space<vmem>>, vector<1x16x4xf32>
    %3 = vector.shape_cast %2 : vector<1x16x4xf32> to vector<16x4xf32>
    %c1 = arith.constant 1 : index
    %c0_6 = arith.constant 0 : index
    %c0_7 = arith.constant 0 : index
    %4 = vector.load %arg2[%c1, %c0_6, %c0_7] : memref<9x16x4xf32, #tpu.memory_space<vmem>>, vector<1x16x4xf32>
    %5 = vector.shape_cast %4 : vector<1x16x4xf32> to vector<16x4xf32>
    %c2 = arith.constant 2 : index
    %c0_8 = arith.constant 0 : index
    %c0_9 = arith.constant 0 : index
    %6 = vector.load %arg2[%c2, %c0_8, %c0_9] : memref<9x16x4xf32, #tpu.memory_space<vmem>>, vector<1x16x4xf32>
    %7 = vector.shape_cast %6 : vector<1x16x4xf32> to vector<16x4xf32>
    %c3 = arith.constant 3 : index
    %c0_10 = arith.constant 0 : index
    %c0_11 = arith.constant 0 : index
    %8 = vector.load %arg2[%c3, %c0_10, %c0_11] : memref<9x16x4xf32, #tpu.memory_space<vmem>>, vector<1x16x4xf32>
    %9 = vector.shape_cast %8 : vector<1x16x4xf32> to vector<16x4xf32>
    %c4 = arith.constant 4 : index
    %c0_12 = arith.constant 0 : index
    %c0_13 = arith.constant 0 : index
    %10 = vector.load %arg2[%c4, %c0_12, %c0_13] : memref<9x16x4xf32, #tpu.memory_space<vmem>>, vector<1x16x4xf32>
    %11 = vector.shape_cast %10 : vector<1x16x4xf32> to vector<16x4xf32>
    %c5 = arith.constant 5 : index
    %c0_14 = arith.constant 0 : index
    %c0_15 = arith.constant 0 : index
    %12 = vector.load %arg2[%c5, %c0_14, %c0_15] : memref<9x16x4xf32, #tpu.memory_space<vmem>>, vector<1x16x4xf32>
    %13 = vector.shape_cast %12 : vector<1x16x4xf32> to vector<16x4xf32>
    %c6 = arith.constant 6 : index
    %c0_16 = arith.constant 0 : index
    %c0_17 = arith.constant 0 : index
    %14 = vector.load %arg2[%c6, %c0_16, %c0_17] : memref<9x16x4xf32, #tpu.memory_space<vmem>>, vector<1x16x4xf32>
    %15 = vector.shape_cast %14 : vector<1x16x4xf32> to vector<16x4xf32>
    %c7 = arith.constant 7 : index
    %c0_18 = arith.constant 0 : index
    %c0_19 = arith.constant 0 : index
    %16 = vector.load %arg2[%c7, %c0_18, %c0_19] : memref<9x16x4xf32, #tpu.memory_space<vmem>>, vector<1x16x4xf32>
    %17 = vector.shape_cast %16 : vector<1x16x4xf32> to vector<16x4xf32>
    %c8 = arith.constant 8 : index
    %c0_20 = arith.constant 0 : index
    %c0_21 = arith.constant 0 : index
    %18 = vector.load %arg2[%c8, %c0_20, %c0_21] : memref<9x16x4xf32, #tpu.memory_space<vmem>>, vector<1x16x4xf32>
    %19 = vector.shape_cast %18 : vector<1x16x4xf32> to vector<16x4xf32>
    %c0_22 = arith.constant 0 : index
    %c0_23 = arith.constant 0 : index
    %20 = vector.load %arg6[%c0_22, %c0_23] : memref<16x16xf32, #tpu.memory_space<vmem>>, vector<16x16xf32>
    %c0_24 = arith.constant 0 : index
    %c0_25 = arith.constant 0 : index
    %21 = vector.load %arg4[%c0_24, %c0_25] : memref<16x1xf32, #tpu.memory_space<vmem>>, vector<16x1xf32>
    %c0_26 = arith.constant 0 : index
    %c0_27 = arith.constant 0 : index
    %22 = vector.load %arg5[%c0_26, %c0_27] : memref<16x1xf32, #tpu.memory_space<vmem>>, vector<16x1xf32>
    %cst = arith.constant 0.000000e+00 : f32
    %23 = vector.broadcast %cst : f32 to vector<16x288xf32>
    %c0_28 = arith.constant 0 : index
    %c0_29 = arith.constant 0 : index
    %c0_30 = arith.constant 0 : index
    %24 = vector.load %arg1[%c0_28, %c0_29, %c0_30] : memref<1x4x342xf32, #tpu.memory_space<vmem>>, vector<1x4x288xf32>
    %25 = vector.shape_cast %24 : vector<1x4x288xf32> to vector<4x288xf32>
    %cst_31 = arith.constant dense<0.000000e+00> : vector<16x288xf32>
    %26 = tpu.matmul %3, %25, %cst_31 {dimension_numbers = #tpu.dot_dimension_numbers<[1], [0], [0], [1], [0, 0, 1, 1], [], []>} : vector<16x4xf32>, vector<4x288xf32>, vector<16x288xf32> -> vector<16x288xf32>
    %27 = arith.addf %23, %26 : vector<16x288xf32>
    %c0_32 = arith.constant 0 : index
    %c0_33 = arith.constant 0 : index
    %c1_34 = arith.constant 1 : index
    %28 = vector.load %arg1[%c0_32, %c0_33, %c1_34] : memref<1x4x342xf32, #tpu.memory_space<vmem>>, vector<1x4x288xf32>
    %29 = vector.shape_cast %28 : vector<1x4x288xf32> to vector<4x288xf32>
    %cst_35 = arith.constant dense<0.000000e+00> : vector<16x288xf32>
    %30 = tpu.matmul %5, %29, %cst_35 {dimension_numbers = #tpu.dot_dimension_numbers<[1], [0], [0], [1], [0, 0, 1, 1], [], []>} : vector<16x4xf32>, vector<4x288xf32>, vector<16x288xf32> -> vector<16x288xf32>
    %31 = arith.addf %27, %30 : vector<16x288xf32>
    %c0_36 = arith.constant 0 : index
    %c0_37 = arith.constant 0 : index
    %c2_38 = arith.constant 2 : index
    %32 = vector.load %arg1[%c0_36, %c0_37, %c2_38] : memref<1x4x342xf32, #tpu.memory_space<vmem>>, vector<1x4x288xf32>
    %33 = vector.shape_cast %32 : vector<1x4x288xf32> to vector<4x288xf32>
    %cst_39 = arith.constant dense<0.000000e+00> : vector<16x288xf32>
    %34 = tpu.matmul %7, %33, %cst_39 {dimension_numbers = #tpu.dot_dimension_numbers<[1], [0], [0], [1], [0, 0, 1, 1], [], []>} : vector<16x4xf32>, vector<4x288xf32>, vector<16x288xf32> -> vector<16x288xf32>
    %35 = arith.addf %31, %34 : vector<16x288xf32>
    %c0_40 = arith.constant 0 : index
    %c0_41 = arith.constant 0 : index
    %c18 = arith.constant 18 : index
    %36 = vector.load %arg1[%c0_40, %c0_41, %c18] : memref<1x4x342xf32, #tpu.memory_space<vmem>>, vector<1x4x288xf32>
    %37 = vector.shape_cast %36 : vector<1x4x288xf32> to vector<4x288xf32>
    %cst_42 = arith.constant dense<0.000000e+00> : vector<16x288xf32>
    %38 = tpu.matmul %9, %37, %cst_42 {dimension_numbers = #tpu.dot_dimension_numbers<[1], [0], [0], [1], [0, 0, 1, 1], [], []>} : vector<16x4xf32>, vector<4x288xf32>, vector<16x288xf32> -> vector<16x288xf32>
    %39 = arith.addf %35, %38 : vector<16x288xf32>
    %c0_43 = arith.constant 0 : index
    %c0_44 = arith.constant 0 : index
    %c19 = arith.constant 19 : index
    %40 = vector.load %arg1[%c0_43, %c0_44, %c19] : memref<1x4x342xf32, #tpu.memory_space<vmem>>, vector<1x4x288xf32>
    %41 = vector.shape_cast %40 : vector<1x4x288xf32> to vector<4x288xf32>
    %cst_45 = arith.constant dense<0.000000e+00> : vector<16x288xf32>
    %42 = tpu.matmul %11, %41, %cst_45 {dimension_numbers = #tpu.dot_dimension_numbers<[1], [0], [0], [1], [0, 0, 1, 1], [], []>} : vector<16x4xf32>, vector<4x288xf32>, vector<16x288xf32> -> vector<16x288xf32>
    %43 = arith.addf %39, %42 : vector<16x288xf32>
    %c0_46 = arith.constant 0 : index
    %c0_47 = arith.constant 0 : index
    %c20 = arith.constant 20 : index
    %44 = vector.load %arg1[%c0_46, %c0_47, %c20] : memref<1x4x342xf32, #tpu.memory_space<vmem>>, vector<1x4x288xf32>
    %45 = vector.shape_cast %44 : vector<1x4x288xf32> to vector<4x288xf32>
    %cst_48 = arith.constant dense<0.000000e+00> : vector<16x288xf32>
    %46 = tpu.matmul %13, %45, %cst_48 {dimension_numbers = #tpu.dot_dimension_numbers<[1], [0], [0], [1], [0, 0, 1, 1], [], []>} : vector<16x4xf32>, vector<4x288xf32>, vector<16x288xf32> -> vector<16x288xf32>
    %47 = arith.addf %43, %46 : vector<16x288xf32>
    %c0_49 = arith.constant 0 : index
    %c0_50 = arith.constant 0 : index
    %c36 = arith.constant 36 : index
    %48 = vector.load %arg1[%c0_49, %c0_50, %c36] : memref<1x4x342xf32, #tpu.memory_space<vmem>>, vector<1x4x288xf32>
    %49 = vector.shape_cast %48 : vector<1x4x288xf32> to vector<4x288xf32>
    %cst_51 = arith.constant dense<0.000000e+00> : vector<16x288xf32>
    %50 = tpu.matmul %15, %49, %cst_51 {dimension_numbers = #tpu.dot_dimension_numbers<[1], [0], [0], [1], [0, 0, 1, 1], [], []>} : vector<16x4xf32>, vector<4x288xf32>, vector<16x288xf32> -> vector<16x288xf32>
    %51 = arith.addf %47, %50 : vector<16x288xf32>
    %c0_52 = arith.constant 0 : index
    %c0_53 = arith.constant 0 : index
    %c37 = arith.constant 37 : index
    %52 = vector.load %arg1[%c0_52, %c0_53, %c37] : memref<1x4x342xf32, #tpu.memory_space<vmem>>, vector<1x4x288xf32>
    %53 = vector.shape_cast %52 : vector<1x4x288xf32> to vector<4x288xf32>
    %cst_54 = arith.constant dense<0.000000e+00> : vector<16x288xf32>
    %54 = tpu.matmul %17, %53, %cst_54 {dimension_numbers = #tpu.dot_dimension_numbers<[1], [0], [0], [1], [0, 0, 1, 1], [], []>} : vector<16x4xf32>, vector<4x288xf32>, vector<16x288xf32> -> vector<16x288xf32>
    %55 = arith.addf %51, %54 : vector<16x288xf32>
    %c0_55 = arith.constant 0 : index
    %c0_56 = arith.constant 0 : index
    %c38 = arith.constant 38 : index
    %56 = vector.load %arg1[%c0_55, %c0_56, %c38] : memref<1x4x342xf32, #tpu.memory_space<vmem>>, vector<1x4x288xf32>
    %57 = vector.shape_cast %56 : vector<1x4x288xf32> to vector<4x288xf32>
    %cst_57 = arith.constant dense<0.000000e+00> : vector<16x288xf32>
    %58 = tpu.matmul %19, %57, %cst_57 {dimension_numbers = #tpu.dot_dimension_numbers<[1], [0], [0], [1], [0, 0, 1, 1], [], []>} : vector<16x4xf32>, vector<4x288xf32>, vector<16x288xf32> -> vector<16x288xf32>
    %59 = arith.addf %55, %58 : vector<16x288xf32>
    %60 = vector.broadcast %1 : vector<16x1xf32> to vector<16x288xf32>
    %61 = arith.addf %59, %60 : vector<16x288xf32>
    %62 = vector.broadcast %0 : vector<1x288xf32> to vector<16x288xf32>
    %63 = arith.mulf %61, %62 : vector<16x288xf32>
    %cst_58 = arith.constant dense<0.000000e+00> : vector<16xf32>
    %64 = vector.multi_reduction <add>, %63, %cst_58 [1] : vector<16x288xf32> to vector<16xf32>
    %65 = vector.shape_cast %64 : vector<16xf32> to vector<16x1xf32>
    %cst_59 = arith.constant dense<0.000000e+00> : vector<16x1xf32>
    %66 = tpu.matmul %20, %65, %cst_59 {dimension_numbers = #tpu.dot_dimension_numbers<[1], [0], [0], [1], [0, 0, 1, 1], [], []>} : vector<16x16xf32>, vector<16x1xf32>, vector<16x1xf32> -> vector<16x1xf32>
    %67 = vector.broadcast %66 : vector<16x1xf32> to vector<16x288xf32>
    %68 = arith.subf %61, %67 : vector<16x288xf32>
    %69 = vector.broadcast %0 : vector<1x288xf32> to vector<16x288xf32>
    %70 = arith.mulf %68, %69 : vector<16x288xf32>
    %71 = arith.mulf %70, %70 : vector<16x288xf32>
    %cst_60 = arith.constant dense<0.000000e+00> : vector<16xf32>
    %72 = vector.multi_reduction <add>, %71, %cst_60 [1] : vector<16x288xf32> to vector<16xf32>
    %73 = vector.shape_cast %72 : vector<16xf32> to vector<16x1xf32>
    %cst_61 = arith.constant dense<0.000000e+00> : vector<16x1xf32>
    %74 = tpu.matmul %20, %73, %cst_61 {dimension_numbers = #tpu.dot_dimension_numbers<[1], [0], [0], [1], [0, 0, 1, 1], [], []>} : vector<16x16xf32>, vector<16x1xf32>, vector<16x1xf32> -> vector<16x1xf32>
    %cst_62 = arith.constant 9.99999974E-6 : f32
    %75 = vector.broadcast %cst_62 : f32 to vector<16x1xf32>
    %76 = arith.addf %74, %75 : vector<16x1xf32>
    %77 = math.rsqrt %76 : vector<16x1xf32>
    %78 = vector.broadcast %77 : vector<16x1xf32> to vector<16x288xf32>
    %79 = arith.mulf %68, %78 : vector<16x288xf32>
    %80 = vector.broadcast %21 : vector<16x1xf32> to vector<16x288xf32>
    %81 = arith.mulf %79, %80 : vector<16x288xf32>
    %82 = vector.broadcast %22 : vector<16x1xf32> to vector<16x288xf32>
    %83 = arith.addf %81, %82 : vector<16x288xf32>
    %84 = arith.negf %83 : vector<16x288xf32>
    %85 = math.exp %84 : vector<16x288xf32>
    %cst_63 = arith.constant 1.000000e+00 : f32
    %86 = vector.broadcast %cst_63 : f32 to vector<16x288xf32>
    %87 = arith.addf %86, %85 : vector<16x288xf32>
    %88 = arith.divf %86, %87 : vector<16x288xf32>
    %89 = arith.mulf %83, %88 : vector<16x288xf32>
    %c0_64 = arith.constant 0 : index
    %c0_65 = arith.constant 0 : index
    %c0_66 = arith.constant 0 : index
    %90 = vector.load %arg8[%c0_64, %c0_65, %c0_66] : memref<1x16x288xf32, #tpu.memory_space<vmem>>, vector<1x16x288xf32>
    %91 = vector.shape_cast %90 : vector<1x16x288xf32> to vector<16x288xf32>
    %92 = vector.shape_cast %89 : vector<16x288xf32> to vector<1x16x288xf32>
    tpu.vector_store %arg8[%c0_64, %c0_65, %c0_66], %92 {strides = array<i32>} : memref<1x16x288xf32, #tpu.memory_space<vmem>>, vector<1x16x288xf32>,
    return
  }
  func.func @transform_0(%arg0: i32) -> (i32, i32, i32) {
    %c0_i32 = arith.constant 0 : i32
    %c0_i32_0 = arith.constant 0 : i32
    %c0_i32_1 = arith.constant 0 : i32
    return %arg0, %c0_i32, %c0_i32_0 : i32, i32, i32
  }
  func.func @transform_1(%arg0: i32) -> (i32, i32, i32) {
    %c0_i32 = arith.constant 0 : i32
    %c0_i32_0 = arith.constant 0 : i32
    %c0_i32_1 = arith.constant 0 : i32
    %c0_i32_2 = arith.constant 0 : i32
    return %c0_i32, %c0_i32_0, %c0_i32_1 : i32, i32, i32
  }
  func.func @transform_2(%arg0: i32) -> (i32, i32) {
    %c0_i32 = arith.constant 0 : i32
    %c0_i32_0 = arith.constant 0 : i32
    %c0_i32_1 = arith.constant 0 : i32
    return %c0_i32, %c0_i32_0 : i32, i32
  }
  func.func @transform_3(%arg0: i32) -> (i32, i32) {
    %c0_i32 = arith.constant 0 : i32
    %c0_i32_0 = arith.constant 0 : i32
    %c0_i32_1 = arith.constant 0 : i32
    return %c0_i32, %c0_i32_0 : i32, i32
  }
  func.func @transform_4(%arg0: i32) -> (i32, i32) {
    %c0_i32 = arith.constant 0 : i32
    %c0_i32_0 = arith.constant 0 : i32
    %c0_i32_1 = arith.constant 0 : i32
    return %c0_i32, %c0_i32_0 : i32, i32
  }
  func.func @transform_5(%arg0: i32) -> (i32, i32) {
    %c0_i32 = arith.constant 0 : i32
    %c0_i32_0 = arith.constant 0 : i32
    %c0_i32_1 = arith.constant 0 : i32
    return %c0_i32, %c0_i32_0 : i32, i32
  }
  func.func @transform_6(%arg0: i32) -> (i32, i32) {
    %c0_i32 = arith.constant 0 : i32
    %c0_i32_0 = arith.constant 0 : i32
    %c0_i32_1 = arith.constant 0 : i32
    return %c0_i32, %c0_i32_0 : i32, i32
  }
  func.func @transform_7(%arg0: i32) -> (i32, i32, i32) {
    %c0_i32 = arith.constant 0 : i32
    %c0_i32_0 = arith.constant 0 : i32
    %c0_i32_1 = arith.constant 0 : i32
    return %arg0, %c0_i32, %c0_i32_0 : i32, i32, i32
  }
}

</mosaic_0001>

<bundles_post_ra>
// kernel: conv_block_forward.1
= control target key start
LH: loop header
LB: loop body
LE: loop exit
PB: predicated region body
PF: predicated region fallthrough
CT: control target
= control target key end

     0   :  { %s2700_s24 = smov 0   ;;  %s2963_s0 = inlined_call_operand.vmem [shape: f32[2,4,342], index: 0, kind: input, shape index: {}]   ;;  %s2964_s1 = inlined_call_operand.vmem [shape: f32[9,16,4], index: 1, kind: input, shape index: {}]   ;;  %s2965_s2 = inlined_call_operand.vmem [shape: f32[16,1], index: 2, kind: input, shape index: {}]   ;;  %s2966_s3 = inlined_call_operand.vmem [shape: f32[16,1], index: 3, kind: input, shape index: {}]   ;;  %s2967_s4 = inlined_call_operand.vmem [shape: f32[16,1], index: 4, kind: input, shape index: {}]   ;;  %s2968_s5 = inlined_call_operand.vmem [shape: f32[16,16], index: 5, kind: input, shape index: {}]   ;;  %s2969_s6 = inlined_call_operand.vmem [shape: f32[1,288], index: 6, kind: input, shape index: {}]   ;;  %s2970_s7 = inlined_call_operand.vmem [shape: f32[2,16,288], index: 7, kind: output, shape index: {}]  }
   0x1 LB: > { %s2343_s25 = sadd.s32 4294967295, %s2648_s24   ;;  %p2347_p0 = scmp.ge.s32.totalorder %s2648_s24, 1  ;;  %s2648_s24 = sphi %s2700_s24, %s17_s24  }
   0x2   : > { %p237_p1 = scmp.lt.s32.totalorder %s2648_s24, 3 }
   0x4   : > { %p238_p2 = pnand %p2347_p0, %p237_p1 }
   0x5   : > { %p269_p3 = scmp.lt.s32.totalorder (!%p238_p2), %s2343_s25, 1  ;;  %v2650_v0 = vmov (!%p238_p2), 0.0   ;;  %s2651_s30 = smov (!%p238_p2), 127   ;;  %v280_v11 = vld [vmem:[%s2965_s2] sm:$0xff] (!%p238_p2)  ;;  %v281_v12 = vld [vmem:[%s2965_s2 + $0x8] sm:$0xff] (!%p238_p2)  ;;  %v2659_v13 = vmov (!%p238_p2), 0  }
   0x6   : > { %241 = sbr.rel (%p238_p2) target bundleno = 1479 (0x5c7), region = 48  ;;  %406 = vmatprep.mubr.f32.mxu1 (!%p238_p2), %v2650_v0  ;;  %748 = vmatprep.mubr.f32.mxu0 (!%p238_p2), %v2650_v0  ;;  %s2652_s8 = smov (!%p238_p2), 126   ;;  %vm325_vm0 = vcmask (!%p238_p2), 1039360   ;;  %vm335_vm1 = vcmask (!%p238_p2), 1043456   ;;  %v2350_v19 = vld [vmem:[%s2964_s1 + $0x10] sm:$0xff] (!%p238_p2)  ;;  %vm328_vm2 = vcmask (!%p238_p2), 31744  }
   0x7   : > { %s2653_s9 = smov (!%p238_p2), 110   ;;  %s2654_s10 = smov (!%p238_p2), 109   ;;  %2611 = vset.pattern.permute.xlu0 (!%p238_p2), %v2659_v13  ;;  %2612 = vset.pattern.permute.xlu1 (!%p238_p2), %v2659_v13  ;;  %vm669_vm3 = vcmask (!%p238_p2), 1031168   ;;  %v2351_v25 = vld [vmem:[%s2964_s1 + $0x18] sm:$0xff] (!%p238_p2)  ;;  %v2352_v26 = vld [vmem:[%s2964_s1 + $0x20] sm:$0xff] (!%p238_p2)  ;;  %vm853_vm4 = vcmask (!%p238_p2), 900096  }
   0x8   : > { %s2655_s11 = smov (!%p238_p2), 108   ;;  %s2656_s12 = smov (!%p238_p2), 92   ;;  %v2353_v29 = vld [vmem:[%s2964_s1 + $0x28] sm:$0xff] (!%p238_p2)  ;;  %v282_v34 = vld [vmem:[%s2964_s1] sm:$0xff] (!%p238_p2)  ;;  %v2354_v35 = vld [vmem:[%s2964_s1 + $0x30] sm:$0xff] (!%p238_p2)  ;;  %vm1037_vm5 = vcmask (!%p238_p2), 891904  }
   0x9   : > { %s2657_s13 = smov (!%p238_p2), 91   ;;  %s2658_s14 = smov (!%p238_p2), 90   ;;  %v283_v38 = vld [vmem:[%s2964_s1 + $0x8] sm:$0xff] (!%p238_p2)  ;;  %v2355_v39 = vld [vmem:[%s2964_s1 + $0x38] sm:$0xff] (!%p238_p2)  ;;  %vm1221_vm6 = vcmask (!%p238_p2), 883712   ;;  %v2356_v44 = vld [vmem:[%s2964_s1 + $0x40] sm:$0xff] (!%p238_p2) }
   0xa   : > { %v2357_v48 = vld [vmem:[%s2964_s1 + $0x48] sm:$0xff] (!%p238_p2)  ;;  %vm1405_vm7 = vcmask (!%p238_p2), 752640   ;;  %v2358_v52 = vld [vmem:[%s2964_s1 + $0x50] sm:$0xff] (!%p238_p2)  ;;  %vm1589_vm8 = vcmask (!%p238_p2), 744448   ;;  %v2359_v57 = vld [vmem:[%s2964_s1 + $0x58] sm:$0xff] (!%p238_p2)  ;;  %vm1773_vm9 = vcmask (!%p238_p2), 736256  }
   0xb   : > { %v2360_v60 = vld [vmem:[%s2964_s1 + $0x60] sm:$0xff] (!%p238_p2)  ;;  %vm1985_vm10 = vcmask (!%p238_p2), 261120   ;;  %vm1995_vm11 = vcmask (!%p238_p2), 130048  }
   0xd   : > { %s2972_s25 = smov (!%p269_p3, %s2343_s25), 1 }
   0xe   : > { %s2591_s26 = smul.u32 12, %s2972_s25 }
  0x10   : > { %s2716_s29 = scalar_lea.vmem %s2963_s0, %s2591_s26 }
  0x11   : > { %v2719_v1 = vld [vmem:[%s2716_s29] sm:$0xff]  ;;  %v2728_v3 = vld [vmem:[%s2716_s29 + $0x8] sm:$0xf] }
  0x12   : > { %319 = vrot.lane.b32.xlu1 %v2719_v1, %s2651_s30  ;;  %v2724_v2 = vcombine.high %v2719_v1, %v2719_v1  ;;  %v659_v4 = vld [vmem:[%s2716_s29 + $0x8] sm:$0xf] }
  0x13   : > { %v843_v5 = vld [vmem:[%s2716_s29 + $0x8] sm:$0xf] }
  0x14   : > { %321 = vrot.lane.b32.xlu0 %v2724_v2, %s2651_s30  ;;  %v1027_v6 = vld [vmem:[%s2716_s29 + $0x8] sm:$0xf] }
  0x15   : > { %v1211_v7 = vld [vmem:[%s2716_s29 + $0x8] sm:$0xf] }
  0x16   : > { %665 = vrot.lane.b32.xlu1 %v2724_v2, %s2652_s8  ;;  %v1395_v8 = vld [vmem:[%s2716_s29 + $0x8] sm:$0xf] }
  0x17   : > { %v1579_v9 = vld [vmem:[%s2716_s29 + $0x8] sm:$0xf] }
  0x18   : > { %323 = vrot.lane.b32.xlu0 %v2728_v3, %s2651_s30  ;;  %v1763_v10 = vld [vmem:[%s2716_s29 + $0x8] sm:$0xf]  ;;  %s2592_s29 = smul.u32 48, %s2972_s25 }
  0x1a   : > { %663 = vrot.lane.b32.xlu1 %v2719_v1, %s2652_s8 }
  0x1c   : > { %667 = vrot.lane.b32.xlu0 %v659_v4, %s2652_s8 }
  0x1e   : > { %851 = vrot.lane.b32.xlu1 %v843_v5, %s2653_s9 }
  0x20   : > { %849 = vrot.lane.b32.xlu0 %v2724_v2, %s2653_s9 }
  0x22   : > { %1033 = vrot.lane.b32.xlu1 %v2724_v2, %s2654_s10 }
  0x24   : > { %847 = vrot.lane.b32.xlu0 %v2719_v1, %s2653_s9  ;;  %s278_s9 = scalar_lea.vmem %s2970_s7, %s2592_s29 }
  0x26   : > { %1031 = vrot.lane.b32.xlu1 %v2719_v1, %s2654_s10 }
  0x28   : > { %1035 = vrot.lane.b32.xlu0 %v1027_v6, %s2654_s10  ;;  %v2363_v6 = vld [vmem:[%s2964_s1 + $0x78] sm:$0xff] }
  0x2a   : > { %1219 = vrot.lane.b32.xlu1 %v1211_v7, %s2655_s11  ;;  %v2364_v7 = vld [vmem:[%s2964_s1 + $0x80] sm:$0xff] }
  0x2c   : > { %1217 = vrot.lane.b32.xlu0 %v2724_v2, %s2655_s11 }
  0x2e   : > { %1401 = vrot.lane.b32.xlu1 %v2724_v2, %s2656_s12 }
  0x30   : > { %1215 = vrot.lane.b32.xlu0 %v2719_v1, %s2655_s11 }
  0x32   : > { %1399 = vrot.lane.b32.xlu1 %v2719_v1, %s2656_s12 }
  0x34   : > { %1403 = vrot.lane.b32.xlu0 %v1395_v8, %s2656_s12  ;;  %v2365_v8 = vld [vmem:[%s2964_s1 + $0x88] sm:$0xff] }
  0x36   : > { %1587 = vrot.lane.b32.xlu1 %v1579_v9, %s2657_s13 }
  0x38   : > { %1585 = vrot.lane.b32.xlu0 %v2724_v2, %s2657_s13 }
  0x3a   : > { %1769 = vrot.lane.b32.xlu1 %v2724_v2, %s2658_s14 }
  0x3c   : > { %1583 = vrot.lane.b32.xlu0 %v2719_v1, %s2657_s13 }
  0x3e   : > { %1767 = vrot.lane.b32.xlu1 %v2719_v1, %s2658_s14 }
  0x40   : > { %1771 = vrot.lane.b32.xlu0 %v1763_v10, %s2658_s14 }
  0x42   : > { %1953 = vperm.xlu1 %2612, %v281_v12  }
  0x44   : > { %1948 = vperm.xlu0 %2611, %v280_v11  }
  0x84   : > { %v320_v14 = vpop.permute.xlu1 %319 }
  0x86   : > { %v322_v15 = vpop.permute.xlu0 %321 }
  0x87   : > { %v326_v20 = vsel %vm325_vm0, %v320_v14, %v322_v15 }
  0x88   : > { %v666_v16 = vpop.permute.xlu1 %665 }
  0x8a   : > { %v324_v17 = vpop.permute.xlu0 %323 }
  0x8b   : > { %v327_v18 = vsel %vm325_vm0, %v322_v15, %v324_v17 }
  0x8c   : > { %2366 = vmatprep.subr.msk.mxu1 %vm335_vm1, %v327_v18  ;;  %v664_v21 = vpop.permute.xlu1 %663 }
  0x8d   : > { %2367 = vmatpush1.msk.msra.mxu1 %vm335_vm1, %v326_v20  ;;  %v670_v23 = vsel %vm669_vm3, %v664_v21, %v666_v16  ;;  %v1963_v20 = vlaneseq }
  0x8e   : > { %2368 = vmatmul.mubr.msk.f32.vlgmr.msra.gmra.mrb[0].mxu1 %vm328_vm2, %v2350_v19  ;;  %2476 = vmatprep.subr.msk.mxu1 %vm335_vm1, %v324_v17  ;;  %v668_v22 = vpop.permute.xlu0 %667 }
  0x8f   : > { %2477 = vmatpush3.msk.msra.mxu1 %vm335_vm1, %v324_v17  ;;  %v671_v24 = vsel %vm669_vm3, %v666_v16, %v668_v22  ;;  %412 = vmatprep.mubr.f32.mxu1 %v2650_v0  ;;  %v1964_v21 = vshrl.u32 %v1963_v20, 7  ;;  %v310_v20 = vld [vmem:[%s2966_s3] sm:$0xff] }
  0x90   : > { %2380 = vmatprep.subr.msk.mxu0 %vm335_vm1, %v671_v24  ;;  %v2774_v27 = vpop.permute.xlu1 %851  ;;  %2373 = vmatprep.subr.msk.mxu1 %vm335_vm1, %v2724_v2 }
  0x91   : > { %2381 = vmatpush1.msk.msra.mxu0 %vm335_vm1, %v670_v23  ;;  %v1965_v23 = vsub.s32 0, %v1964_v21  ;;  %v1969_v24 = vsub.s32 1, %v1964_v21 }
  0x92   : > { %2369 = vmatmul.mubr.msk.f32.gmra.mrb[2].mxu1 %vm328_vm2, %v2351_v25  ;;  %2382 = vmatmul.mubr.msk.f32.vlgmr.msra.gmra.mrb[0].mxu0 %vm328_vm2, %v2352_v26  ;;  %v850_v28 = vpop.permute.xlu0 %849 }
  0x93   : > { %2478 = vmatprep.mubr.msk.f32.mxu1 %vm328_vm2, %v2350_v19  ;;  %754 = vmatprep.mubr.f32.mxu0 %v2650_v0  ;;  %v855_v30 = vsel %vm853_vm4, %v850_v28, %v2774_v27 }
  0x94   : > { %2387 = vmatprep.subr.msk.mxu0 %vm335_vm1, %v855_v30  ;;  %v1034_v31 = vpop.permute.xlu1 %1033 }
  0x96   : > { %2479 = vmatmul.mubr.msk.f32.vlgmr.msra.gmra.mrb[4].mxu1 %vm328_vm2, %v2351_v25  ;;  %2383 = vmatmul.mubr.msk.f32.gmra.mrb[2].mxu0 %vm328_vm2, %v2353_v29  ;;  %v848_v32 = vpop.permute.xlu0 %847 }
  0x97   : > { %2374 = vmatpush1.msk.msra.mxu1 %vm335_vm1, %v2719_v1  ;;  %v854_v33 = vsel %vm853_vm4, %v848_v32, %v850_v28  ;;  %570 = vmatprep.mubr.f32.mxu1 %v2650_v0  ;;  %v2361_v1 = vld [vmem:[%s2964_s1 + $0x68] sm:$0xff] }
  0x98   : > { %2481 = vmatprep.subr.msk.mxu1 %vm335_vm1, %v2728_v3  ;;  %2388 = vmatpush1.msk.msra.mxu0 %vm335_vm1, %v854_v33  ;;  %v1032_v36 = vpop.permute.xlu1 %1031 }
  0x99   : > { %932 = vmatprep.mubr.f32.mxu0 %v2650_v0  ;;  %v1038_v41 = vsel %vm1037_vm5, %v1032_v36, %v1034_v31 }
  0x9a   : > { %2375 = vmatmul.mubr.msk.f32.vlgmr.msra.gmra.mrb[0].mxu1 %vm328_vm2, %v282_v34  ;;  %2389 = vmatmul.mubr.msk.f32.vlgmr.msra.gmra.mrb[0].mxu0 %vm328_vm2, %v2354_v35  ;;  %v2805_v37 = vpop.permute.xlu0 %1035 }
  0x9b   : > { %2482 = vmatpush3.msk.msra.mxu1 %vm335_vm1, %v2728_v3  ;;  %576 = vmatprep.mubr.f32.mxu1 %v2650_v0  ;;  %v1039_v40 = vsel %vm1037_vm5, %v1034_v31, %v2805_v37  ;;  %v2362_v3 = vld [vmem:[%s2964_s1 + $0x70] sm:$0xff] }
  0x9c   : > { %2486 = vmatprep.subr.msk.mxu1 %vm335_vm1, %v668_v22  ;;  %938 = vmatprep.mubr.f32.mxu0 %v2650_v0  ;;  %v2819_v42 = vpop.permute.xlu1 %1219 }
  0x9d   : > { %2394 = vmatprep.subr.msk.mxu0 %vm335_vm1, %v1039_v40 }
  0x9e   : > { %2376 = vmatmul.mubr.msk.f32.gmra.mrb[2].mxu1 %vm328_vm2, %v283_v38  ;;  %2390 = vmatmul.mubr.msk.f32.gmra.mrb[2].mxu0 %vm328_vm2, %v2355_v39  ;;  %v1218_v43 = vpop.permute.xlu0 %1217 }
  0x9f   : > { %2483 = vmatprep.mubr.msk.f32.mxu1 %vm328_vm2, %v282_v34  ;;  %2395 = vmatpush1.msk.msra.mxu0 %vm335_vm1, %v1038_v41  ;;  %v1223_v45 = vsel %vm1221_vm6, %v1218_v43, %v2819_v42 }
  0xa0   : > { %1116 = vmatprep.mubr.f32.mxu0 %v2650_v0  ;;  %2401 = vmatprep.subr.msk.mxu0 %vm335_vm1, %v1223_v45  ;;  %v1402_v46 = vpop.permute.xlu1 %1401 }
  0xa2   : > { %2484 = vmatmul.mubr.msk.f32.vlgmr.msra.gmra.mrb[4].mxu1 %vm328_vm2, %v283_v38  ;;  %2396 = vmatmul.mubr.msk.f32.vlgmr.msra.gmra.mrb[0].mxu0 %vm328_vm2, %v2356_v44  ;;  %v1216_v47 = vpop.permute.xlu0 %1215 }
  0xa3   : > { %2487 = vmatpush3.msk.msra.mxu1 %vm335_vm1, %v668_v22  ;;  %1122 = vmatprep.mubr.f32.mxu0 %v2650_v0  ;;  %v1222_v49 = vsel %vm1221_vm6, %v1216_v47, %v1218_v43 }
  0xa4   : > { %2491 = vmatprep.subr.msk.mxu1 %vm335_vm1, %v2774_v27  ;;  %2488 = vmatprep.mubr.msk.f32.mxu1 %vm328_vm2, %v2352_v26  ;;  %v1400_v50 = vpop.permute.xlu1 %1399  ;;  %v279_v26 = vld [vmem:[%s2969_s6] sm:$0x7] }
  0xa5   : > { %2402 = vmatpush1.msk.msra.mxu0 %vm335_vm1, %v1222_v49  ;;  %v1406_v55 = vsel %vm1405_vm7, %v1400_v50, %v1402_v46  ;;  %v1966_v32 = vrot.slane %v279_v26, %v1965_v23  ;;  %v1970_v33 = vrot.slane %v279_v26, %v1969_v24 }
  0xa6   : > { %2397 = vmatmul.mubr.msk.f32.gmra.mrb[2].mxu0 %vm328_vm2, %v2357_v48  ;;  %v1404_v51 = vpop.permute.xlu0 %1403 }
  0xa7   : > { %1300 = vmatprep.mubr.f32.mxu0 %v2650_v0  ;;  %v1407_v53 = vsel %vm1405_vm7, %v1402_v46, %v1404_v51 }
  0xa8   : > { %2408 = vmatprep.subr.msk.mxu0 %vm335_vm1, %v1407_v53  ;;  %v1588_v54 = vpop.permute.xlu1 %1587 }
  0xaa   : > { %2489 = vmatmul.mubr.msk.f32.vlgmr.msra.gmra.mrb[4].mxu1 %vm328_vm2, %v2353_v29  ;;  %2403 = vmatmul.mubr.msk.f32.vlgmr.msra.gmra.mrb[0].mxu0 %vm328_vm2, %v2358_v52  ;;  %v1586_v56 = vpop.permute.xlu0 %1585 }
  0xab   : > { %2492 = vmatpush3.msk.msra.mxu1 %vm335_vm1, %v2774_v27  ;;  %1306 = vmatprep.mubr.f32.mxu0 %v2650_v0  ;;  %v1591_v58 = vsel %vm1589_vm8, %v1586_v56, %v1588_v54  ;;  %v1973_v27 = vsub.s32 2, %v1964_v21  ;;  %v311_v21 = vld [vmem:[%s2966_s3 + $0x8] sm:$0xff] }
  0xac   : > { %2496 = vmatprep.subr.msk.mxu1 %vm335_vm1, %v2805_v37  ;;  %2493 = vmatprep.mubr.msk.f32.mxu1 %vm328_vm2, %v2354_v35  ;;  %v1770_v61 = vpop.permute.xlu1 %1769 }
  0xad   : > { %2409 = vmatpush1.msk.msra.mxu0 %vm335_vm1, %v1406_v55  ;;  %v1974_v34 = vrot.slane %v279_v26, %v1973_v27  ;;  %v309_v55 = vld [vmem:[%s2968_s5 + $0x8] sm:$0xff] }
  0xae   : > { %2404 = vmatmul.mubr.msk.f32.gmra.mrb[2].mxu0 %vm328_vm2, %v2359_v57  ;;  %v1584_v59 = vpop.permute.xlu0 %1583  ;;  %2415 = vmatprep.subr.msk.mxu0 %vm335_vm1, %v1591_v58 }
  0xaf   : > { %1484 = vmatprep.mubr.f32.mxu0 %v2650_v0  ;;  %v1590_v62 = vsel %vm1589_vm8, %v1584_v59, %v1586_v56 }
  0xb0   : > { %v1768_v4 = vpop.permute.xlu1 %1767 }
  0xb1   : > { %v1774_v5 = vsel %vm1773_vm9, %v1768_v4, %v1770_v61 }
  0xb2   : > { %2494 = vmatmul.mubr.msk.f32.vlgmr.msra.gmra.mrb[4].mxu1 %vm328_vm2, %v2355_v39  ;;  %2410 = vmatmul.mubr.msk.f32.vlgmr.msra.gmra.mrb[0].mxu0 %vm328_vm2, %v2360_v60  ;;  %v1772_v63 = vpop.permute.xlu0 %1771 }
  0xb3   : > { %2497 = vmatpush3.msk.msra.mxu1 %vm335_vm1, %v2805_v37  ;;  %1490 = vmatprep.mubr.f32.mxu0 %v2650_v0  ;;  %v1775_v2 = vsel %vm1773_vm9, %v1770_v61, %v1772_v63 }
  0xb4   : > { %2501 = vmatprep.subr.msk.mxu1 %vm335_vm1, %v2819_v42  ;;  %2498 = vmatprep.mubr.msk.f32.mxu1 %vm328_vm2, %v2356_v44 }
  0xb5   : > { %2416 = vmatpush1.msk.msra.mxu0 %vm335_vm1, %v1590_v62 }
  0xb6   : > { %2411 = vmatmul.mubr.msk.f32.gmra.mrb[2].mxu0 %vm328_vm2, %v2361_v1  ;;  %2422 = vmatprep.subr.msk.mxu0 %vm335_vm1, %v1775_v2 }
  0xb7   : > { %1668 = vmatprep.mubr.f32.mxu0 %v2650_v0 }
  0xba   : > { %2499 = vmatmul.mubr.msk.f32.vlgmr.msra.gmra.mrb[4].mxu1 %vm328_vm2, %v2357_v48  ;;  %2417 = vmatmul.mubr.msk.f32.vlgmr.msra.gmra.mrb[0].mxu0 %vm328_vm2, %v2362_v3 }
  0xbb   : > { %2502 = vmatpush3.msk.msra.mxu1 %vm335_vm1, %v2819_v42  ;;  %1674 = vmatprep.mubr.f32.mxu0 %v2650_v0 }
  0xbc   : > { %2506 = vmatprep.subr.msk.mxu1 %vm335_vm1, %v1404_v51  ;;  %2503 = vmatprep.mubr.msk.f32.mxu1 %vm328_vm2, %v2358_v52 }
  0xbd   : > { %2423 = vmatpush1.msk.msra.mxu0 %vm335_vm1, %v1774_v5 }
  0xbe   : > { %2418 = vmatmul.mubr.msk.f32.gmra.mrb[2].mxu0 %vm328_vm2, %v2363_v6 }
  0xbf   : > { %1852 = vmatprep.mubr.f32.mxu0 %v2650_v0 }
  0xc1   : > { %v1954_v22 = vpop.permute.xlu1 %1953 }
  0xc2   : > { %2504 = vmatmul.mubr.msk.f32.vlgmr.msra.gmra.mrb[4].mxu1 %vm328_vm2, %v2359_v57  ;;  %2424 = vmatmul.mubr.msk.f32.vlgmr.msra.gmra.mrb[0].mxu0 %vm328_vm2, %v2364_v7 }
  0xc3   : > { %2507 = vmatpush3.msk.msra.mxu1 %vm335_vm1, %v1404_v51  ;;  %1858 = vmatprep.mubr.f32.mxu0 %v2650_v0  ;;  %v1949_v25 = vpop.permute.xlu0 %1948  ;;  %v308_v51 = vld [vmem:[%s2968_s5] sm:$0xff] }
  0xc4   : > { %2511 = vmatprep.subr.msk.mxu1 %vm335_vm1, %v1588_v54  ;;  %2508 = vmatprep.mubr.msk.f32.mxu1 %vm328_vm2, %v2360_v60 }
  0xc6   : > { %2425 = vmatmul.mubr.msk.f32.gmra.mrb[2].mxu0 %vm328_vm2, %v2365_v8 }
  0xca   : > { %2509 = vmatmul.mubr.msk.f32.vlgmr.msra.gmra.mrb[4].mxu1 %vm328_vm2, %v2361_v1 }
  0xcb   : > { %2512 = vmatpush3.msk.msra.mxu1 %vm335_vm1, %v1588_v54  ;;  %2513 = vmatprep.mubr.msk.f32.mxu1 %vm328_vm2, %v2362_v3 }
  0xcc   : > { %2516 = vmatprep.subr.msk.mxu1 %vm335_vm1, %v1772_v63 }
  0xd2   : > { %2514 = vmatmul.mubr.msk.f32.vlgmr.msra.gmra.mrb[4].mxu1 %vm328_vm2, %v2363_v6 }
  0xd3   : > { %2517 = vmatpush3.msk.msra.mxu1 %vm335_vm1, %v1772_v63  ;;  %2518 = vmatprep.mubr.msk.f32.mxu1 %vm328_vm2, %v2364_v7 }
  0xda   : > { %2519 = vmatmul.mubr.msk.f32.vlgmr.msra.gmra.mrb[4].mxu1 %vm328_vm2, %v2365_v8 }
  0xdb   : > { %2525 = vmatprep.mubr.msk.f32.mxu1 %vm1995_vm11, %v308_v51 }
 0x16d   : > { %v572_v0 = vpop.f32.mrb[0].mxu1 }
 0x16e   : > { %v574_v9 = vpop.f32.mrb[1].mxu1 }
 0x171   : > { %v578_v10 = vpop.f32.mrb[2].mxu1 }
 0x172   : > { %v580_v11 = vpop.f32.mrb[3].mxu1 }
 0x195   : > { %v1854_v12 = vpop.f32.mrb[0].mxu0 }
 0x196   : > { %v2543_v13 = vadd.f32 %v1854_v12, %v572_v0  ;;  %v1856_v14 = vpop.f32.mrb[1].mxu0 }
 0x197   : > { %v2544_v15 = vadd.f32 %v1856_v14, %v574_v9 }
 0x198   : > { %v1956_v30 = vadd.f32 %v2543_v13, %v1949_v25 }
 0x199   : > { %v1860_v16 = vpop.f32.mrb[2].mxu0  ;;  %v1957_v31 = vadd.f32 %v2544_v15, %v1949_v25 }
 0x19a   : > { %v2545_v17 = vadd.f32 %v1860_v16, %v578_v10  ;;  %v1862_v18 = vpop.f32.mrb[3].mxu0  ;;  %v1978_v40 = vmul.f32 %v1966_v32, %v1956_v30 }
 0x19b   : > { %v2546_v19 = vadd.f32 %v1862_v18, %v580_v11  ;;  %v1979_v41 = vmul.f32 %v1970_v33, %v1957_v31 }
 0x19c   : > { %v1959_v28 = vadd.f32 %v2545_v17, %v1954_v22 }
 0x19d   : > { %v1960_v29 = vadd.f32 %v2546_v19, %v1954_v22  ;;  %v1984_v47 = vadd.f32 %v1979_v41, %v1978_v40 }
 0x19e   : > { %v1981_v36 = vmul.f32 %v1966_v32, %v1959_v28 }
 0x19f   : > { %v1982_v37 = vmul.f32 %v1970_v33, %v1960_v29 }
 0x1a1   : > { %v1990_v45 = vadd.f32 %v1982_v37, %v1981_v36 }
 0x1ad   : > { %v2520_v35 = vpop.f32.mrb[4].mxu1 }
 0x1ae   : > { %v1961_v38 = vadd.f32 %v2520_v35, %v1954_v22  ;;  %v1931_v39 = vpop.f32.mrb[5].mxu1 }
 0x1af   : > { %v1958_v42 = vadd.f32 %v1949_v25, %v1931_v39 }
 0x1b0   : > { %v1983_v43 = vmul.f32 %v1974_v34, %v1961_v38 }
 0x1b1   : > { %v1980_v44 = vmul.f32 %v1974_v34, %v1958_v42 }
 0x1b2   : > { %v1991_v46 = vsel %vm1985_vm10, %v1983_v43, 0.0 }
 0x1b3   : > { %v1992_v48 = vadd.f32 %v1991_v46, %v1990_v45  ;;  %v1986_v49 = vsel %vm1985_vm10, %v1980_v44, 0.0 }
 0x1b4   : > { %v1987_v50 = vadd.f32 %v1986_v49, %v1984_v47 }
 0x1b5   : > { %1993 = vadd.xlane.f32.xlu0 %v1992_v48 }
 0x1b6   : > { %1988 = vadd.xlane.f32.xlu1 %v1987_v50 }
 0x242   : > { %v1994_v52 = vpop.xlane.xlu0 %1993 }
 0x243   : > { %v1989_v53 = vpop.xlane.xlu1 %1988 }
 0x244   : > { %v2535_v54 = vpack.c.bf16 %v1994_v52, %v1989_v53 }
 0x246   : > { %2536 = vmatprep.subr.bf16.mxu1 %v2535_v54 }
 0x247   : > { %2538 = vmatpush3.bf16.msra.mxu1 %v2535_v54 }
 0x24a   : > { %2526 = vmatmul.mubr.msk.f32.vlgmr.msra.gmra.mrb[6].mxu1 %vm1995_vm11, %v309_v55 }
 0x24b   : > { %2532 = vmatprep.mubr.msk.f32.mxu1 %vm1995_vm11, %v308_v51 }
 0x31d   : > { %v2527_v56 = vpop.f32.mrb[6].mxu1 }
 0x31e   : > { %2084 = vperm.xlu1 %2612, %v2527_v56   ;;  %v2068_v57 = vpop.f32.mrb[7].mxu1 }
 0x31f   : > { %2079 = vperm.xlu0 %2611, %v2068_v57  }
 0x39d   : > { %v2085_v58 = vpop.permute.xlu1 %2084 }
 0x39e   : > { %v2090_v59 = vsub.f32 %v1959_v28, %v2085_v58  ;;  %v2091_v60 = vsub.f32 %v1960_v29, %v2085_v58  ;;  %v2092_v61 = vsub.f32 %v1961_v38, %v2085_v58  ;;  %v2080_v62 = vpop.permute.xlu0 %2079 }
 0x39f   : > { %v2087_v63 = vsub.f32 %v1956_v30, %v2080_v62  ;;  %v2088_v1 = vsub.f32 %v1957_v31, %v2080_v62  ;;  %v2089_v2 = vsub.f32 %v1958_v42, %v2080_v62  ;;  %v312_v31 = vld [vmem:[%s2967_s4] sm:$0xff] }
 0x3a0   : > { %v2096_v3 = vmul.f32 %v2090_v59, %v1966_v32  ;;  %v2097_v4 = vmul.f32 %v2091_v60, %v1970_v33  ;;  %v2098_v5 = vmul.f32 %v2092_v61, %v1974_v34 }
 0x3a1   : > { %v2093_v6 = vmul.f32 %v2087_v63, %v1966_v32  ;;  %v2094_v7 = vmul.f32 %v2088_v1, %v1970_v33  ;;  %v2095_v8 = vmul.f32 %v2089_v2, %v1974_v34  ;;  %v313_v32 = vld [vmem:[%s2967_s4 + $0x8] sm:$0xff] }
 0x3a2   : > { %v2102_v0 = vmul.f32 %v2096_v3, %v2096_v3  ;;  %v2103_v9 = vmul.f32 %v2097_v4, %v2097_v4  ;;  %v2104_v10 = vmul.f32 %v2098_v5, %v2098_v5 }
 0x3a3   : > { %v2099_v11 = vmul.f32 %v2093_v6, %v2093_v6  ;;  %v2100_v12 = vmul.f32 %v2094_v7, %v2094_v7  ;;  %v2101_v13 = vmul.f32 %v2095_v8, %v2095_v8 }
 0x3a4   : > { %v2110_v14 = vadd.f32 %v2103_v9, %v2102_v0  ;;  %v2111_v15 = vsel %vm1985_vm10, %v2104_v10, 0.0 }
 0x3a5   : > { %v2105_v16 = vadd.f32 %v2100_v12, %v2099_v11  ;;  %v2106_v17 = vsel %vm1985_vm10, %v2101_v13, 0.0 }
 0x3a6   : > { %v2112_v18 = vadd.f32 %v2111_v15, %v2110_v14 }
 0x3a7   : > { %v2107_v19 = vadd.f32 %v2106_v17, %v2105_v16 }
 0x3a8   : > { %2113 = vadd.xlane.f32.xlu0 %v2112_v18 }
 0x3a9   : > { %2108 = vadd.xlane.f32.xlu1 %v2107_v19 }
 0x3ba   : > { %2210 = vperm.xlu1 %2612, %v310_v20  }
 0x3be   : > { %2215 = vperm.xlu0 %2611, %v311_v21  }
 0x435   : > { %v2114_v22 = vpop.xlane.xlu0 %2113 }
 0x436   : > { %v2109_v23 = vpop.xlane.xlu1 %2108 }
 0x437   : > { %v2539_v24 = vpack.c.bf16 %v2114_v22, %v2109_v23 }
 0x439   : > { %2540 = vmatprep.subr.bf16.mxu1 %v2539_v24 }
 0x43a   : > { %2542 = vmatpush3.bf16.msra.mxu1 %v2539_v24  ;;  %v2211_v33 = vpop.permute.xlu1 %2210 }
 0x43d   : > { %2533 = vmatmul.mubr.msk.f32.vlgmr.msra.gmra.mrb[8].mxu1 %vm1995_vm11, %v309_v55  ;;  %v2216_v34 = vpop.permute.xlu0 %2215 }
 0x510   : > { %v2534_v25 = vpop.f32.mrb[8].mxu1 }
 0x511   : > { %v2187_v26 = vadd.f32 1e-05, %v2534_v25  ;;  %v2181_v27 = vpop.f32.mrb[9].mxu1 }
 0x512   : > { %v2182_v28 = vadd.f32 1e-05, %v2181_v27 }
 0x513   : > { %2614 = vrsqrt.f32 %v2187_v26 }
 0x514   : > { %2616 = vrsqrt.f32 %v2182_v28 }
 0x51d   : > { %v2615_v29 = vpop.eup %2614 }
 0x51e   : > { %v2617_v30 = vpop.eup %2616  ;;  %2199 = vperm.xlu1 %2612, %v2615_v29  }
 0x51f   : > { %2194 = vperm.xlu0 %2611, %v2617_v30  }
 0x522   : > { %2226 = vperm.xlu1 %2612, %v312_v31  }
 0x523   : > { %2231 = vperm.xlu0 %2611, %v313_v32  }
 0x59d   : > { %v2200_v35 = vpop.permute.xlu1 %2199 }
 0x59e   : > { %v2205_v36 = vmul.f32 %v2200_v35, %v2090_v59  ;;  %v2206_v37 = vmul.f32 %v2200_v35, %v2091_v60  ;;  %v2207_v38 = vmul.f32 %v2200_v35, %v2092_v61  ;;  %v2195_v39 = vpop.permute.xlu0 %2194 }
 0x59f   : > { %v2202_v40 = vmul.f32 %v2195_v39, %v2087_v63  ;;  %v2203_v41 = vmul.f32 %v2195_v39, %v2088_v1  ;;  %v2204_v42 = vmul.f32 %v2195_v39, %v2089_v2 }
 0x5a0   : > { %v2221_v43 = vmul.f32 %v2216_v34, %v2205_v36  ;;  %v2222_v44 = vmul.f32 %v2216_v34, %v2206_v37  ;;  %v2223_v45 = vmul.f32 %v2216_v34, %v2207_v38 }
 0x5a1   : > { %v2227_v46 = vpop.permute.xlu1 %2226  ;;  %v2218_v47 = vmul.f32 %v2211_v33, %v2202_v40  ;;  %v2219_v48 = vmul.f32 %v2211_v33, %v2203_v41  ;;  %v2220_v49 = vmul.f32 %v2211_v33, %v2204_v42 }
 0x5a2   : > { %v2232_v50 = vpop.permute.xlu0 %2231 }
 0x5a3   : > { %v2234_v51 = vadd.f32 %v2227_v46, %v2218_v47  ;;  %v2235_v52 = vadd.f32 %v2227_v46, %v2219_v48  ;;  %v2236_v53 = vadd.f32 %v2227_v46, %v2220_v49  ;;  %v2237_v54 = vadd.f32 %v2232_v50, %v2221_v43 }
 0x5a4   : > { %v2238_v55 = vadd.f32 %v2232_v50, %v2222_v44  ;;  %v2239_v56 = vadd.f32 %v2232_v50, %v2223_v45 }
 0x5a5   : > { %v2433_v57 = vmul.f32 -1.442695, %v2234_v51  ;;  %v2434_v58 = vmul.f32 -1.442695, %v2235_v52  ;;  %v2435_v59 = vmul.f32 -1.442695, %v2236_v53 }
 0x5a6   : > { %v2436_v60 = vmul.f32 -1.442695, %v2237_v54  ;;  %v2437_v61 = vmul.f32 -1.442695, %v2238_v55  ;;  %v2438_v62 = vmul.f32 -1.442695, %v2239_v56 }
 0x5a7   : > { %2618 = vpow2.f32 %v2433_v57 }
 0x5a8   : > { %2620 = vpow2.f32 %v2434_v58 }
 0x5a9   : > { %2622 = vpow2.f32 %v2435_v59 }
 0x5aa   : > { %2624 = vpow2.f32 %v2436_v60 }
 0x5ab   : > { %2626 = vpow2.f32 %v2437_v61 }
 0x5ac   : > { %2628 = vpow2.f32 %v2438_v62 }
 0x5b1   : > { %v2619_v63 = vpop.eup %2618 }
 0x5b2   : > { %v2621_v1 = vpop.eup %2620  ;;  %v2258_v2 = vadd.f32 1.0, %v2619_v63 }
 0x5b3   : > { %v2623_v3 = vpop.eup %2622  ;;  %v2259_v4 = vadd.f32 1.0, %v2621_v1 }
 0x5b4   : > { %v2625_v5 = vpop.eup %2624  ;;  %v2260_v6 = vadd.f32 1.0, %v2623_v3  ;;  %2630 = vrcp.f32 %v2258_v2 }
 0x5b5   : > { %v2627_v7 = vpop.eup %2626  ;;  %2632 = vrcp.f32 %v2259_v4  ;;  %v2261_v8 = vadd.f32 1.0, %v2625_v5 }
 0x5b6   : > { %v2629_v0 = vpop.eup %2628  ;;  %2634 = vrcp.f32 %v2260_v6  ;;  %v2262_v9 = vadd.f32 1.0, %v2627_v7 }
 0x5b7   : > { %v2263_v10 = vadd.f32 1.0, %v2629_v0  ;;  %2636 = vrcp.f32 %v2261_v8 }
 0x5b8   : > { %2638 = vrcp.f32 %v2262_v9 }
 0x5b9   : > { %2640 = vrcp.f32 %v2263_v10 }
 0x5be   : > { %v2631_v11 = vpop.eup %2630 }
 0x5bf   : > { %v2633_v12 = vpop.eup %2632  ;;  %v2276_v13 = vmul.f32 %v2631_v11, %v2234_v51 }
 0x5c0   : > { %v2635_v14 = vpop.eup %2634  ;;  %v2277_v15 = vmul.f32 %v2633_v12, %v2235_v52 }
 0x5c1   : > { %v2637_v16 = vpop.eup %2636  ;;  %v2278_v17 = vmul.f32 %v2635_v14, %v2236_v53  ;;  %2282 = vst [vmem:[%s278_s9] sm:$0xff] %v2276_v13 }
 0x5c2   : > { %v2639_v18 = vpop.eup %2638  ;;  %2283 = vst [vmem:[%s278_s9 + $0x8] sm:$0xff] %v2277_v15  ;;  %v2279_v19 = vmul.f32 %v2637_v16, %v2237_v54 }
 0x5c3   : > { %v2641_v20 = vpop.eup %2640  ;;  %2284 = vst.msk [vmem:[%s278_s9 + $0x10] sm:$0xff] %vm1985_vm10, %v2278_v17  ;;  %v2280_v21 = vmul.f32 %v2639_v18, %v2238_v55 }
 0x5c4   : > { %v2281_v22 = vmul.f32 %v2641_v20, %v2239_v56  ;;  %2285 = vst [vmem:[%s278_s9 + $0x18] sm:$0xff] %v2279_v19 }
 0x5c5   : > { %2286 = vst [vmem:[%s278_s9 + $0x20] sm:$0xff] %v2280_v21 }
 0x5c6   : > { %2287 = vst.msk [vmem:[%s278_s9 + $0x28] sm:$0xff] %vm1985_vm10, %v2281_v22 }
 0x5c7 PF: > { %s17_s24 = sadd.s32 1, %s2648_s24  }
 0x5c8   : > { %p14_p4 = scmp.ge.s32.totalorder %s17_s24, 4  }
 0x5ca   :  { %16 = sbr.rel (!%p14_p4) target bundleno = 1 (0x1), region = 86 }

</bundles_post_ra>
